<compile_context>
chip_gen: v7x
topology: tpu7x:2x2x1
jax: 0.10.0
libtpu: 0.0.40
codegen_flags: <defaults>
</compile_context>

<pallas_src>
import jax
import jax.numpy as jnp
from jax import lax
from jax.experimental import pallas as pl
from jax.experimental.pallas import tpu as pltpu

_MIB = 1024 * 1024


def _vmem_budgets():
    """Generation-aware (tile_budget_bytes, scoped_vmem_limit_bytes)."""
    cap = None
    try:
        info = pltpu.get_tpu_info()
        cap = getattr(info, "vmem_capacity_bytes", None)
    except Exception:  # pragma: no cover - query not available
        cap = None
    if cap is not None and cap >= 100 * _MIB:
        # v5e / v6e: 128 MiB VMEM per TensorCore.
        return 96 * _MIB, 110 * _MIB
    # v7x (64 MiB per TensorCore) or unknown: leave headroom for Mosaic
    # internal scratch (weight push staging, etc.).
    return 36 * _MIB, 54 * _MIB


def _round_up(x, m):
    return ((x + m - 1) // m) * m


def _pick_tile(dim, candidates, align):
    """Return (tile, padded_dim).

    Prefer the largest candidate that divides `dim` exactly (no padding);
    otherwise pick the candidate that minimizes the padded size (ties go to
    the larger tile).  `candidates` must be sorted descending.
    """
    for c in candidates:
        if c <= dim and dim % c == 0:
            return c, dim
    padded_min = _round_up(dim, align)
    best = None
    for c in candidates:
        if c <= padded_min:
            p = _round_up(dim, c)
            if best is None or p < best[1]:
                best = (c, p)
    if best is not None:
        return best
    return padded_min, padded_min


def _full_k_bytes(tm, tn, n, xb, wb, ob):
    # Double-buffered x / weight / output tiles (no accumulator).
    return 2 * tm * n * xb + 2 * tn * n * wb + 2 * tm * tn * ob


def _tiled_k_bytes(tm, tn, tk, xb, wb, ob):
    # Double-buffered tiles plus the resident f32 accumulator.
    return 2 * tm * tk * xb + 2 * tn * tk * wb + 2 * tm * tn * ob + tm * tn * 4


def _select_config(R, N, M, xb, wb, ob, budget):
    tm_cands = (2048, 1024, 512, 256, 128, 64, 32, 16, 8)
    tn_cands = (1024, 512, 256, 128)

    tm0, _ = _pick_tile(R, tm_cands, 8)
    tn0, _ = _pick_tile(M, tn_cands, 128)

    # Preferred path: whole embedding (contraction) dim resident in VMEM.
    # No K grid axis, no accumulator scratch, no per-K re-streaming of x.
    tm, tn = tm0, tn0
    while _full_k_bytes(tm, tn, N, xb, wb, ob) > budget:
        if tm > 8 and tm * N * xb >= tn * N * wb:
            tm //= 2
        elif tn > 128:
            tn //= 2
        elif tm > 8:
            tm //= 2
        else:
            break
    if _full_k_bytes(tm, tn, N, xb, wb, ob) <= budget:
        return dict(mode="full_k", tm=tm, tn=tn, tk=N,
                    padR=_round_up(R, tm), padM=_round_up(M, tn), padN=N)

    # Fallback (only for very large embedding dims): tile the contraction
    # axis with an f32 accumulator.  Shrink order tk -> tn -> tm; at the
    # (8, 128, 128) minimum this is ~0.4 MiB, so the loop always ends under
    # budget and never re-enters the full-K path.
    tm, tn = tm0, tn0
    tk, _ = _pick_tile(N, (2048, 1024, 512, 256, 128), 128)
    while _tiled_k_bytes(tm, tn, tk, xb, wb, ob) > budget:
        if tk > 128:
            tk //= 2
        elif tn > 128:
            tn //= 2
        elif tm > 8:
            tm //= 2
        else:
            break
    return dict(mode="tiled_k", tm=tm, tn=tn, tk=tk,
                padR=_round_up(R, tm), padM=_round_up(M, tn),
                padN=_round_up(N, tk))


def _proj_kernel_full_k(x_ref, w_ref, o_ref):
    """Whole contraction dim resident: out_tile = x_tile @ w_tile.T (MXU)."""
    # x_ref: (tm, N), w_ref: (tn, N)  ->  o_ref: (tm, tn)
    # Contracting the LAST dim of both operands keeps the weight in its
    # native (vocab, embedding) layout and maps straight onto the MXU weight
    # push (no per-tile XLU transpose).
    o_ref[...] = lax.dot_general(
        x_ref[...],
        w_ref[...],
        dimension_numbers=(((1,), (1,)), ((), ())),
        preferred_element_type=jnp.float32,
    ).astype(o_ref.dtype)


def _proj_kernel_tiled_k(x_ref, w_ref, o_ref, acc_ref):
    """Tiled contraction: accumulate over the K grid axis into f32 scratch.

    The final partial product is fused into the output store (saves one
    accumulator read-modify-write per output tile).
    """
    k = pl.program_id(2)
    nk = pl.num_programs(2)

    part = lax.dot_general(
        x_ref[...],
        w_ref[...],
        dimension_numbers=(((1,), (1,)), ((), ())),
        preferred_element_type=jnp.float32,
    )

    @pl.when(k == 0)
    def _():
        acc_ref[...] = jnp.zeros_like(acc_ref)

    @pl.when(k < nk - 1)
    def _():
        acc_ref[...] += part

    @pl.when(k == nk - 1)
    def _():
        o_ref[...] = (acc_ref[...] + part).astype(o_ref.dtype)


def projection_forward(x, weight):
    """Pallas equivalent of Projection.forward.

    x:      (I, J, N)  -- (batch, seq, embedding)
    weight: (M, N)     -- (vocab, embedding)
    returns (I, J, M)
    """
    I, J, N = x.shape
    M, N2 = weight.shape
    assert N == N2, "embedding dims must match"

    R = I * J
    x2d = x.reshape(R, N)  # contiguous reshape; weight stays (M, N)

    out_dtype = jnp.result_type(x.dtype, weight.dtype)
    xb = jnp.dtype(x.dtype).itemsize
    wb = jnp.dtype(weight.dtype).itemsize
    ob = jnp.dtype(out_dtype).itemsize

    budget, vmem_limit = _vmem_budgets()
    cfg = _select_config(R, N, M, xb, wb, ob, budget)
    tm, tn, tk = cfg["tm"], cfg["tn"], cfg["tk"]
    padR, padM, padN = cfg["padR"], cfg["padM"], cfg["padN"]

    # Zero-pad awkward shapes up to the tile grid (padded rows/cols of the
    # contraction contribute 0; padded output rows/cols are sliced off).
    if padR != R or padN != N:
        x2d = jnp.pad(x2d, ((0, padR - R), (0, padN - N)))
    w2d = weight
    if padM != M or padN != N:
        w2d = jnp.pad(weight, ((0, padM - M), (0, padN - N)))

    flops = 2 * R * M * N

    if cfg["mode"] == "full_k":
        grid_rows = padR // tm
        grid_vocab = padM // tn

        # Pallas only re-issues a DMA when an operand's block index changes,
        # so the operand indexed by the INNER grid axis is re-streamed once
        # per outer block.  Pick the ordering with the smaller HBM traffic.
        traffic_rows_outer = grid_rows * padM * padN * wb + padR * padN * xb
        traffic_vocab_outer = padM * padN * wb + grid_vocab * padR * padN * xb
        vocab_outer = traffic_vocab_outer < traffic_rows_outer
        bytes_accessed = (min(traffic_rows_outer, traffic_vocab_outer)
                          + padR * padM * ob)

        if vocab_outer:
            grid = (grid_vocab, grid_rows)
            x_spec = pl.BlockSpec((tm, padN), lambda j, i: (i, 0))
            w_spec = pl.BlockSpec((tn, padN), lambda j, i: (j, 0))
            o_spec = pl.BlockSpec((tm, tn), lambda j, i: (i, j))
        else:
            grid = (grid_rows, grid_vocab)
            x_spec = pl.BlockSpec((tm, padN), lambda i, j: (i, 0))
            w_spec = pl.BlockSpec((tn, padN), lambda i, j: (j, 0))
            o_spec = pl.BlockSpec((tm, tn), lambda i, j: (i, j))

        y2d = pl.pallas_call(
            _proj_kernel_full_k,
            out_shape=jax.ShapeDtypeStruct((padR, padM), out_dtype),
            grid_spec=pltpu.PrefetchScalarGridSpec(
                num_scalar_prefetch=0,
                grid=grid,
                in_specs=[x_spec, w_spec],
                out_specs=o_spec,
            ),
            compiler_params=pltpu.CompilerParams(
                dimension_semantics=("parallel", "parallel"),
                vmem_limit_bytes=vmem_limit,
            ),
            cost_estimate=pl.CostEstimate(
                flops=flops, transcendentals=0, bytes_accessed=bytes_accessed),
        )(x2d, w2d)
    else:
        # Tiled-K contraction with an f32 accumulator (only for very large N).
        grid = (padR // tm, padM // tn, padN // tk)
        bytes_accessed = (grid[1] * padR * padN * xb
                          + grid[0] * padM * padN * wb
                          + padR * padM * ob)
        y2d = pl.pallas_call(
            _proj_kernel_tiled_k,
            out_shape=jax.ShapeDtypeStruct((padR, padM), out_dtype),
            grid_spec=pltpu.PrefetchScalarGridSpec(
                num_scalar_prefetch=0,
                grid=grid,
                in_specs=[
                    pl.BlockSpec((tm, tk), lambda i, j, k: (i, k)),
                    pl.BlockSpec((tn, tk), lambda i, j, k: (j, k)),
                ],
                out_specs=pl.BlockSpec((tm, tn), lambda i, j, k: (i, j)),
                scratch_shapes=[pltpu.VMEM((tm, tn), jnp.float32)],
            ),
            compiler_params=pltpu.CompilerParams(
                dimension_semantics=("parallel", "parallel", "arbitrary"),
                vmem_limit_bytes=vmem_limit,
            ),
            cost_estimate=pl.CostEstimate(
                flops=flops, transcendentals=0, bytes_accessed=bytes_accessed),
        )(x2d, w2d)

    if padR != R or padM != M:
        y2d = y2d[:R, :M]
    return y2d.reshape(I, J, M)


if __name__ == "__main__":
    # Small shapes consistent with the module's forward:
    #   x: (i, j, embedding) ; weight: (vocab, embedding)
    I, J = 2, 8
    embedding_size = 128
    vocab_size = 256

    key = jax.random.PRNGKey(0)
    kx, kw = jax.random.split(key)

    # Deterministic "uniform_" init for the weight (U[0, 1), like nn.init.uniform_)
    weight = jax.random.uniform(
        kw, (vocab_size, embedding_size), dtype=jnp.float32
    )
    x = jax.random.normal(kx, (I, J, embedding_size), dtype=jnp.float32)

    out = projection_forward(x, weight)
    out = jax.block_until_ready(out)

    # Reference check against plain-JAX einsum (same semantics as torch.einsum)
    ref = jnp.einsum("mn,ijn->ijm", weight, x)
    assert out.shape == (I, J, vocab_size)
    assert jnp.allclose(out, ref, atol=1e-4, rtol=1e-4)

    print("KERNEL_OK")
</pallas_src>

<mosaic_0001>
module attributes {stable_mosaic.version = 11 : i64} {
  func.func @_proj_kernel_full_k(%arg0: i32, %arg1: i32, %arg2: memref<16x128xf32, #tpu.memory_space<vmem>>, %arg3: memref<256x128xf32, #tpu.memory_space<vmem>>, %arg4: memref<16x256xf32, #tpu.memory_space<vmem>>) attributes {dimension_semantics = [#tpu.dimension_semantics<parallel>, #tpu.dimension_semantics<parallel>], iteration_bounds = array<i64: 1, 1>, scalar_prefetch = 0 : i64, scratch_operands = 0 : i64, tpu.core_type = #tpu.core_type<tc>, window_params = [{transform_indices = @transform_0, window_bounds = array<i64: 16, 128>}, {transform_indices = @transform_1, window_bounds = array<i64: 256, 128>}, {transform_indices = @transform_2, window_bounds = array<i64: 16, 256>}]} {
    %c0 = arith.constant 0 : index
    %c0_0 = arith.constant 0 : index
    %0 = vector.load %arg2[%c0, %c0_0] : memref<16x128xf32, #tpu.memory_space<vmem>>, vector<16x128xf32>
    %c0_1 = arith.constant 0 : index
    %c0_2 = arith.constant 0 : index
    %1 = vector.load %arg3[%c0_1, %c0_2] : memref<256x128xf32, #tpu.memory_space<vmem>>, vector<256x128xf32>
    %cst = arith.constant dense<0.000000e+00> : vector<16x256xf32>
    %2 = tpu.matmul %0, %1, %cst {dimension_numbers = #tpu.dot_dimension_numbers<[1], [1], [0], [0], [0, 0, 1, 0], [], []>} : vector<16x128xf32>, vector<256x128xf32>, vector<16x256xf32> -> vector<16x256xf32>
    %c0_3 = arith.constant 0 : index
    %c0_4 = arith.constant 0 : index
    %3 = vector.load %arg4[%c0_3, %c0_4] : memref<16x256xf32, #tpu.memory_space<vmem>>, vector<16x256xf32>
    tpu.vector_store %arg4[%c0_3, %c0_4], %2 {strides = array<i32>} : memref<16x256xf32, #tpu.memory_space<vmem>>, vector<16x256xf32>,
    return
  }
  func.func @transform_0(%arg0: i32, %arg1: i32) -> (i32, i32) {
    %c0_i32 = arith.constant 0 : i32
    %c0_i32_0 = arith.constant 0 : i32
    return %arg0, %c0_i32 : i32, i32
  }
  func.func @transform_1(%arg0: i32, %arg1: i32) -> (i32, i32) {
    %c0_i32 = arith.constant 0 : i32
    %c0_i32_0 = arith.constant 0 : i32
    return %arg1, %c0_i32 : i32, i32
  }
  func.func @transform_2(%arg0: i32, %arg1: i32) -> (i32, i32) {
    %c0_i32 = arith.constant 0 : i32
    return %arg0, %arg1 : i32, i32
  }
}

</mosaic_0001>

<bundles_post_ra>
// kernel: tpu_custom_call.1
= control target key start
LH: loop header
LB: loop body
LE: loop exit
PB: predicated region body
PF: predicated region fallthrough
CT: control target
= control target key end

     0   :  { %7 = vsyncpa [#allocation3], 0  ;;  %s394_s0 = inlined_call_operand.hbm [shape: f32[16,128], index: 0, kind: input, shape index: {}]   ;;  %s395_s1 = inlined_call_operand.hbm [shape: f32[256,128], index: 1, kind: input, shape index: {}]   ;;  %s396_s2 = inlined_call_operand.hbm [shape: f32[16,256], index: 2, kind: output, shape index: {}]  }
   0x1   :  { %8 = vsyncpa [#allocation6], 0 }
   0x2   :  { %9 = vsyncpa [#allocation4], 0  ;;  %s336_s9 = smov [#allocation2]   ;;  %s264_s13 = scalar_lea.hbm %s394_s0, 256 }
   0x3   :  { %s15_s10 = sshll.u32 %s336_s9, 4  ;;  %p265_p0 = scmp.ne.s32.totalorder %s394_s0, %s264_s13  ;;  %s16_s10 = int_to_ptr.vmem [resolvable:$true] %s15_s10 }
   0x4   :  { %p268_p1 = scmp.lt.u32.totalorder %s264_s13, %s394_s0 }
   0x6   :  { %p270_p2 = pnand %p268_p1, %p265_p0 }
   0x8   :  { %273 = shalt.err (!%p270_p2)
}
   0x9   :  { %s274_s18 = scalar_lea.vmem %s16_s10, 256  ;;  %p279_p4 = scmp.lt.s32.totalorder %s16_s10, %s16_s10 }
   0xa   :  { %p275_p3 = scmp.ne.s32.totalorder %s16_s10, %s274_s18  ;;  %p280_p5 = scmp.lt.s32.totalorder %s274_s18, %s274_s18 }
   0xc   :  { %p281_p6 = por %p280_p5, %p279_p4 }
   0xe   :  { %p282_p7 = pnand %p281_p6, %p275_p3 }
  0x10   :  { %285 = shalt.err (!%p282_p7)
}
  0x11   :  { %s337_s19 = smov 128   ;;  %s338_s20 = smov 8  }
  0x12   :  { %21 = dma.hbm_to_vmem [thread:$0]  %s394_s0, 256, %s16_s10, [#allocation3], %s337_s19, %s337_s19, %s338_s20  }
  0x13   :  { %s339_s23 = smov [#allocation5]   ;;  %s286_s27 = scalar_lea.hbm %s395_s1, 4096 }
  0x14   :  { %s27_s24 = sshll.u32 %s339_s23, 4  ;;  %p287_p8 = scmp.ne.s32.totalorder %s395_s1, %s286_s27  ;;  %s28_s24 = int_to_ptr.vmem [resolvable:$true] %s27_s24 }
  0x15   :  { %p290_p9 = scmp.lt.u32.totalorder %s286_s27, %s395_s1 }
  0x17   :  { %p292_p10 = pnand %p290_p9, %p287_p8 }
  0x19   :  { %295 = shalt.err (!%p292_p10)
}
  0x1a   :  { %s296_s4 = scalar_lea.vmem %s28_s24, 4096  ;;  %p301_p12 = scmp.lt.s32.totalorder %s28_s24, %s28_s24 }
  0x1b   :  { %p297_p11 = scmp.ne.s32.totalorder %s28_s24, %s296_s4  ;;  %p302_p13 = scmp.lt.s32.totalorder %s296_s4, %s296_s4 }
  0x1d   :  { %p303_p0 = por %p302_p13, %p301_p12 }
  0x1f   :  { %p304_p1 = pnand %p303_p0, %p297_p11 }
  0x21   :  { %307 = shalt.err (!%p304_p1)
}
  0x22   :  { %33 = dma.hbm_to_vmem [thread:$0]  %s395_s1, 4096, %s28_s24, [#allocation6], %s337_s19, %s337_s19, %s338_s20  }
  0x23   :  { %330 = dma.done.wait [#allocation3], 256  }
  0x24   :  { %331 = vsyncadd [#allocation3], 4294967040 }
  0x25   :  { %332 = dma.done.wait [#allocation6], 4096  }
  0x26   :  { %333 = vsyncadd [#allocation6], 4294963200  ;;  %v58_v0 = vld [vmem:[#allocation5 + $0x80] sm:$0xff]  ;;  %v59_v1 = vld [vmem:[#allocation5 + $0x88] sm:$0xff]  ;;  %s340_s1 = smov [#allocation7]  }
  0x27   :  { %v42_v2 = vld [vmem:[#allocation5] sm:$0xff]  ;;  %v209_v3 = vpack.c.bf16 %v59_v1, %v58_v0  ;;  %v43_v4 = vld [vmem:[#allocation5 + $0x8] sm:$0xff]  ;;  %v60_v5 = vld [vmem:[#allocation5 + $0x90] sm:$0xff]  ;;  %s160_s6 = sshll.u32 %s340_s1, 4  ;;  %s161_s6 = int_to_ptr.vmem [resolvable:$true] %s160_s6 }
  0x28   :  { %v61_v6 = vld [vmem:[#allocation5 + $0x98] sm:$0xff]  ;;  %v211_v7 = vpack.c.bf16 %v43_v4, %v42_v2  ;;  %v44_v9 = vld [vmem:[#allocation5 + $0x10] sm:$0xff]  ;;  %v62_v11 = vld [vmem:[#allocation5 + $0xa0] sm:$0xff]  ;;  %s308_s7 = scalar_lea.vmem %s161_s6, 512  ;;  %p313_p3 = scmp.lt.s32.totalorder %s161_s6, %s161_s6 }
  0x29   :  { %v213_v8 = vpack.c.bf16 %v61_v6, %v60_v5  ;;  %210 = vmatprep.subr.bf16.mxu0 %v209_v3  ;;  %241 = vmatprep.subr.bf16.mxu1 %v209_v3  ;;  %v45_v10 = vld [vmem:[#allocation5 + $0x18] sm:$0xff]  ;;  %v63_v12 = vld [vmem:[#allocation5 + $0xa8] sm:$0xff]  ;;  %v40_v15 = vld [vmem:[#allocation2] sm:$0xff]  ;;  %p309_p2 = scmp.ne.s32.totalorder %s161_s6, %s308_s7  ;;  %p314_p4 = scmp.lt.s32.totalorder %s308_s7, %s308_s7 }
  0x2a   :  { %212 = vmatpush3.bf16.xpose.msra.mxu0 %v211_v7  ;;  %249 = vmatpush3.bf16.xpose.msra.mxu1 %v211_v7  ;;  %v215_v13 = vpack.c.bf16 %v45_v10, %v44_v9  ;;  %v217_v14 = vpack.c.bf16 %v63_v12, %v62_v11  ;;  %v41_v16 = vld [vmem:[#allocation2 + $0x8] sm:$0xff]  ;;  %v46_v17 = vld [vmem:[#allocation5 + $0x20] sm:$0xff]  ;;  %v47_v18 = vld [vmem:[#allocation5 + $0x28] sm:$0xff] }
  0x2b   :  { %214 = vmatprep.subr.bf16.mxu0 %v213_v8  ;;  %242 = vmatprep.subr.bf16.mxu1 %v213_v8  ;;  %v64_v19 = vld [vmem:[#allocation5 + $0xb0] sm:$0xff]  ;;  %v65_v20 = vld [vmem:[#allocation5 + $0xb8] sm:$0xff]  ;;  %v219_v21 = vpack.c.bf16 %v47_v18, %v46_v17  ;;  %v66_v25 = vld [vmem:[#allocation5 + $0xc0] sm:$0xff]  ;;  %p315_p5 = por %p314_p4, %p313_p3 }
  0x2c   :  { %205 = vmatprep.mubr.f32.mxu0 %v40_v15  ;;  %207 = vmatprep.mubr.f32.mxu1 %v41_v16  ;;  %v221_v22 = vpack.c.bf16 %v65_v20, %v64_v19  ;;  %v48_v23 = vld [vmem:[#allocation5 + $0x30] sm:$0xff]  ;;  %v49_v24 = vld [vmem:[#allocation5 + $0x38] sm:$0xff]  ;;  %v67_v26 = vld [vmem:[#allocation5 + $0xc8] sm:$0xff] }
  0x2d   :  { %v223_v27 = vpack.c.bf16 %v49_v24, %v48_v23  ;;  %v225_v28 = vpack.c.bf16 %v67_v26, %v66_v25  ;;  %v50_v29 = vld [vmem:[#allocation5 + $0x40] sm:$0xff]  ;;  %v51_v30 = vld [vmem:[#allocation5 + $0x48] sm:$0xff]  ;;  %v68_v31 = vld [vmem:[#allocation5 + $0xd0] sm:$0xff]  ;;  %p316_p6 = pnand %p315_p5, %p309_p2 }
  0x2e   :  { %v69_v32 = vld [vmem:[#allocation5 + $0xd8] sm:$0xff]  ;;  %v227_v33 = vpack.c.bf16 %v51_v30, %v50_v29  ;;  %v52_v35 = vld [vmem:[#allocation5 + $0x50] sm:$0xff]  ;;  %v70_v37 = vld [vmem:[#allocation5 + $0xe0] sm:$0xff] }
  0x2f   :  { %v229_v34 = vpack.c.bf16 %v69_v32, %v68_v31  ;;  %v53_v36 = vld [vmem:[#allocation5 + $0x58] sm:$0xff]  ;;  %v71_v38 = vld [vmem:[#allocation5 + $0xe8] sm:$0xff]  ;;  %v54_v41 = vld [vmem:[#allocation5 + $0x60] sm:$0xff] }
  0x30   :  { %v231_v39 = vpack.c.bf16 %v53_v36, %v52_v35  ;;  %v233_v40 = vpack.c.bf16 %v71_v38, %v70_v37  ;;  %v55_v42 = vld [vmem:[#allocation5 + $0x68] sm:$0xff]  ;;  %v72_v43 = vld [vmem:[#allocation5 + $0xf0] sm:$0xff]  ;;  %v73_v44 = vld [vmem:[#allocation5 + $0xf8] sm:$0xff] }
  0x31   :  { %v235_v45 = vpack.c.bf16 %v55_v42, %v54_v41  ;;  %v237_v46 = vpack.c.bf16 %v73_v44, %v72_v43  ;;  %v56_v47 = vld [vmem:[#allocation5 + $0x70] sm:$0xff]  ;;  %v57_v48 = vld [vmem:[#allocation5 + $0x78] sm:$0xff] }
  0x32   :  { %216 = vmatpush3.bf16.xpose.msra.mxu0 %v215_v13  ;;  %250 = vmatpush3.bf16.xpose.msra.mxu1 %v215_v13  ;;  %v239_v49 = vpack.c.bf16 %v57_v48, %v56_v47 }
  0x33   :  { %218 = vmatprep.subr.bf16.mxu0 %v217_v14  ;;  %243 = vmatprep.subr.bf16.mxu1 %v217_v14 }
  0x3a   :  { %220 = vmatpush3.bf16.xpose.msra.mxu0 %v219_v21  ;;  %251 = vmatpush3.bf16.xpose.msra.mxu1 %v219_v21 }
  0x3b   :  { %222 = vmatprep.subr.bf16.mxu0 %v221_v22  ;;  %244 = vmatprep.subr.bf16.mxu1 %v221_v22 }
  0x42   :  { %224 = vmatpush3.bf16.xpose.msra.mxu0 %v223_v27  ;;  %252 = vmatpush3.bf16.xpose.msra.mxu1 %v223_v27 }
  0x43   :  { %226 = vmatprep.subr.bf16.mxu0 %v225_v28  ;;  %245 = vmatprep.subr.bf16.mxu1 %v225_v28 }
  0x4a   :  { %228 = vmatpush3.bf16.xpose.msra.mxu0 %v227_v33  ;;  %253 = vmatpush3.bf16.xpose.msra.mxu1 %v227_v33 }
  0x4b   :  { %230 = vmatprep.subr.bf16.mxu0 %v229_v34  ;;  %246 = vmatprep.subr.bf16.mxu1 %v229_v34 }
  0x52   :  { %232 = vmatpush3.bf16.xpose.msra.mxu0 %v231_v39  ;;  %254 = vmatpush3.bf16.xpose.msra.mxu1 %v231_v39 }
  0x53   :  { %234 = vmatprep.subr.bf16.mxu0 %v233_v40  ;;  %247 = vmatprep.subr.bf16.mxu1 %v233_v40 }
  0x5a   :  { %236 = vmatpush3.bf16.xpose.msra.mxu0 %v235_v45  ;;  %255 = vmatpush3.bf16.xpose.msra.mxu1 %v235_v45 }
  0x5b   :  { %238 = vmatprep.subr.bf16.mxu0 %v237_v46  ;;  %248 = vmatprep.subr.bf16.mxu1 %v237_v46 }
  0x62   :  { %240 = vmatpush3.bf16.xpose.msra.mxu0 %v239_v49  ;;  %256 = vmatpush3.bf16.xpose.msra.mxu1 %v239_v49 }
  0x69   :  { %206 = vmatmul.mubr.f32.vlgmr.msra.gmra.mrb[0].mxu0 %v40_v15  ;;  %208 = vmatmul.mubr.f32.vlgmr.msra.gmra.mrb[0].mxu1 %v41_v16 }
 0x13c   :  { %v140_v50 = vpop.f32.mrb[0].mxu0  ;;  %v146_v51 = vpop.f32.mrb[0].mxu1 }
 0x13d   :  { %151 = vst [vmem:[#allocation7] sm:$0xff] %v140_v50  ;;  %153 = vst [vmem:[#allocation7 + $0x10] sm:$0xff] %v146_v51  ;;  %v142_v52 = vpop.f32.mrb[1].mxu0  ;;  %v148_v53 = vpop.f32.mrb[1].mxu1 }
 0x13e   :  { %152 = vst [vmem:[#allocation7 + $0x8] sm:$0xff] %v142_v52  ;;  %154 = vst [vmem:[#allocation7 + $0x18] sm:$0xff] %v148_v53 }
 0x13f   :  { %319 = shalt.err (!%p316_p6)
}
 0x140   :  { %s320_s10 = scalar_lea.hbm %s396_s2, 512 }
 0x141   :  { %p321_p7 = scmp.ne.s32.totalorder %s396_s2, %s320_s10  ;;  %p324_p8 = scmp.lt.u32.totalorder %s320_s10, %s396_s2 }
 0x143   :  { %p326_p9 = pnand %p324_p8, %p321_p7 }
 0x145   :  { %329 = shalt.err (!%p326_p9)
}
 0x146   :  { %s341_s15 = smov 256   ;;  %s342_s16 = smov 16  }
 0x147   :  { %166 = dma.vmem_to_hbm [thread:$0]  %s161_s6, 512, %s396_s2, [#allocation4], %s341_s15, %s341_s15, %s342_s16  }
 0x148   :  { %334 = dma.done.wait [#allocation4], 512  }
 0x149   :  { %335 = vsyncadd [#allocation4], 4294966784 }
 0x14a   :  { %170 = vsyncpa [#allocation3], 1 }
 0x14b   :  { %171 = vsyncpa [#allocation6], 1 }
 0x14c   :  { %172 = vsyncpa [#allocation4], 1 }

</bundles_post_ra>
